<compile_context>
chip_gen: v6e
topology: v6e:2x2x1
jax: 0.10.0
libtpu: 0.0.40
codegen_flags: <defaults>
</compile_context>

<pallas_src>
import math

import jax
import jax.numpy as jnp
from jax.experimental import pallas as pl
from jax.experimental.pallas import tpu as pltpu


PAD = 128          # output lane width (MXU native)
K = 32             # contraction width: 20 hidden features + bias carrier, padded to 32
IN_DIM = 2
HIDDEN = 20
OUT_DIM = 2
LAYER_DIMS = [(IN_DIM, HIDDEN)] + [(HIDDEN, HIDDEN)] * 8 + [(HIDDEN, OUT_DIM)]
NUM_LAYERS = len(LAYER_DIMS)   # 10


def mlp_kernel(x_ref, w_ref, o_ref):
    """Fused 10-layer forward pass, everything resident in VMEM.

    x_ref: (batch, K) with real features in lanes [0, IN_DIM) and a constant
           1.0 in lane K-1 (bias carrier).
    w_ref: (NUM_LAYERS, K, PAD); real weights in the top-left block, bias
           folded into row K-1, and W[K-1, K-1] = 1 so the carrier lane stays
           1 through every layer (ReLU(1) == 1, padded lanes stay exactly 0).
    o_ref: (batch, PAD) lane-dense output; real logits in lanes [0, OUT_DIM).
    """
    # layer 1: LHS is the (batch, K) padded input directly
    h = jnp.maximum(
        jnp.dot(x_ref[...], w_ref[0], preferred_element_type=jnp.float32), 0.0)
    # layers 2..9: contract only the live first-K lanes of the activation
    for i in range(1, NUM_LAYERS - 1):
        z = jnp.dot(h[:, :K], w_ref[i], preferred_element_type=jnp.float32)
        h = jnp.maximum(z, 0.0)
    # layer 10: no ReLU
    o_ref[...] = jnp.dot(h[:, :K], w_ref[NUM_LAYERS - 1],
                         preferred_element_type=jnp.float32).astype(o_ref.dtype)


@jax.jit
def simplenet_forward(x, w_packed):
    """x: (batch, IN_DIM) float32. w_packed: (NUM_LAYERS, K, PAD) float32."""
    batch = x.shape[0]
    k = w_packed.shape[-2]
    pad = w_packed.shape[-1]

    # Single fused construction of the padded activation: [x | zeros | 1].
    xp = jnp.concatenate(
        [x.astype(jnp.float32),
         jnp.zeros((batch, k - x.shape[1] - 1), jnp.float32),
         jnp.ones((batch, 1), jnp.float32)],
        axis=1)

    vmem = pl.BlockSpec(memory_space=pltpu.MemorySpace.VMEM)
    cost = pl.CostEstimate(
        flops=2 * batch * k * pad * NUM_LAYERS,
        transcendentals=0,
        bytes_accessed=w_packed.size * 4 + batch * k * 4 + batch * pad * 4)

    out_padded = pl.pallas_call(
        mlp_kernel,
        out_shape=jax.ShapeDtypeStruct((batch, pad), jnp.float32),
        in_specs=[vmem, vmem],
        out_specs=vmem,
        cost_estimate=cost,
    )(xp, w_packed)
    # slice fuses inside the jit
    return out_padded[:, :OUT_DIM]


def init_params(key):
    """PyTorch nn.Linear default init: U(-1/sqrt(fan_in), 1/sqrt(fan_in)).
    Weights stored as (in, out); bias as (out,)."""
    params = []
    for fan_in, fan_out in LAYER_DIMS:
        key, kw, kb = jax.random.split(key, 3)
        bound = 1.0 / math.sqrt(fan_in)
        w = jax.random.uniform(kw, (fan_in, fan_out), jnp.float32, -bound, bound)
        b = jax.random.uniform(kb, (fan_out,), jnp.float32, -bound, bound)
        params.append((w, b))
    return params


def pack_params(params, k=K, pad=PAD):
    """Pack all layers into one (L, K, PAD) slab with the bias folded into the
    last contraction row. Padded rows/columns are exactly zero so nothing
    leaks through ReLU; [K-1, K-1] = 1 keeps the constant-1 carrier lane
    alive layer-to-layer."""
    w_packed = jnp.zeros((len(params), k, pad), jnp.float32)
    for i, (w, b) in enumerate(params):
        fan_in, fan_out = w.shape
        assert fan_in < k - 1 and fan_out < k - 1
        w_packed = w_packed.at[i, :fan_in, :fan_out].set(w)
        w_packed = w_packed.at[i, k - 1, :fan_out].set(b)   # folded bias row
        w_packed = w_packed.at[i, k - 1, k - 1].set(1.0)    # carrier lane
    return w_packed


def reference_forward(x, params):
    h = x
    for i, (w, b) in enumerate(params):
        h = h @ w + b
        if i < len(params) - 1:
            h = jnp.maximum(h, 0.0)
    return h


if __name__ == "__main__":
    key = jax.random.PRNGKey(0)
    key, kx = jax.random.split(key)

    batch = 8
    x = jax.random.normal(kx, (batch, IN_DIM), dtype=jnp.float32)

    params = init_params(key)
    w_packed = pack_params(params)

    out = simplenet_forward(x, w_packed)
    out = jax.block_until_ready(out)

    # sanity check against a pure-JAX reference of the same math
    ref = reference_forward(x, params)
    assert out.shape == (batch, OUT_DIM)
    assert jnp.allclose(out, ref, atol=1e-4, rtol=1e-4), (
        f"max abs err {jnp.max(jnp.abs(out - ref))}")

    print("KERNEL_OK")
</pallas_src>

<mosaic_0001>
module attributes {stable_mosaic.version = 11 : i64} {
  func.func @mlp_kernel(%arg0: memref<8x32xf32, #tpu.memory_space<vmem>>, %arg1: memref<10x32x128xf32, #tpu.memory_space<vmem>>, %arg2: memref<8x128xf32, #tpu.memory_space<vmem>>) attributes {dimension_semantics = [], scalar_prefetch = 0 : i64, scratch_operands = 0 : i64, tpu.core_type = #tpu.core_type<tc>} {
    %c0 = arith.constant 0 : index
    %c0_0 = arith.constant 0 : index
    %0 = vector.load %arg0[%c0, %c0_0] : memref<8x32xf32, #tpu.memory_space<vmem>>, vector<8x32xf32>
    %c0_1 = arith.constant 0 : index
    %c0_2 = arith.constant 0 : index
    %c0_3 = arith.constant 0 : index
    %1 = vector.load %arg1[%c0_1, %c0_2, %c0_3] : memref<10x32x128xf32, #tpu.memory_space<vmem>>, vector<1x32x128xf32>
    %2 = vector.shape_cast %1 : vector<1x32x128xf32> to vector<32x128xf32>
    %cst = arith.constant dense<0.000000e+00> : vector<8x128xf32>
    %3 = tpu.matmul %0, %2, %cst {dimension_numbers = #tpu.dot_dimension_numbers<[1], [0], [0], [1], [0, 0, 1, 1], [], []>} : vector<8x32xf32>, vector<32x128xf32>, vector<8x128xf32> -> vector<8x128xf32>
    %cst_4 = arith.constant 0.000000e+00 : f32
    %4 = vector.broadcast %cst_4 : f32 to vector<8x128xf32>
    %5 = arith.maximumf %3, %4 : vector<8x128xf32>
    %6 = vector.extract_strided_slice %5 {offsets = [0, 0], sizes = [8, 32], strides = [1, 1]} : vector<8x128xf32> to vector<8x32xf32>
    %c1 = arith.constant 1 : index
    %c0_5 = arith.constant 0 : index
    %c0_6 = arith.constant 0 : index
    %7 = vector.load %arg1[%c1, %c0_5, %c0_6] : memref<10x32x128xf32, #tpu.memory_space<vmem>>, vector<1x32x128xf32>
    %8 = vector.shape_cast %7 : vector<1x32x128xf32> to vector<32x128xf32>
    %cst_7 = arith.constant dense<0.000000e+00> : vector<8x128xf32>
    %9 = tpu.matmul %6, %8, %cst_7 {dimension_numbers = #tpu.dot_dimension_numbers<[1], [0], [0], [1], [0, 0, 1, 1], [], []>} : vector<8x32xf32>, vector<32x128xf32>, vector<8x128xf32> -> vector<8x128xf32>
    %cst_8 = arith.constant 0.000000e+00 : f32
    %10 = vector.broadcast %cst_8 : f32 to vector<8x128xf32>
    %11 = arith.maximumf %9, %10 : vector<8x128xf32>
    %12 = vector.extract_strided_slice %11 {offsets = [0, 0], sizes = [8, 32], strides = [1, 1]} : vector<8x128xf32> to vector<8x32xf32>
    %c2 = arith.constant 2 : index
    %c0_9 = arith.constant 0 : index
    %c0_10 = arith.constant 0 : index
    %13 = vector.load %arg1[%c2, %c0_9, %c0_10] : memref<10x32x128xf32, #tpu.memory_space<vmem>>, vector<1x32x128xf32>
    %14 = vector.shape_cast %13 : vector<1x32x128xf32> to vector<32x128xf32>
    %cst_11 = arith.constant dense<0.000000e+00> : vector<8x128xf32>
    %15 = tpu.matmul %12, %14, %cst_11 {dimension_numbers = #tpu.dot_dimension_numbers<[1], [0], [0], [1], [0, 0, 1, 1], [], []>} : vector<8x32xf32>, vector<32x128xf32>, vector<8x128xf32> -> vector<8x128xf32>
    %cst_12 = arith.constant 0.000000e+00 : f32
    %16 = vector.broadcast %cst_12 : f32 to vector<8x128xf32>
    %17 = arith.maximumf %15, %16 : vector<8x128xf32>
    %18 = vector.extract_strided_slice %17 {offsets = [0, 0], sizes = [8, 32], strides = [1, 1]} : vector<8x128xf32> to vector<8x32xf32>
    %c3 = arith.constant 3 : index
    %c0_13 = arith.constant 0 : index
    %c0_14 = arith.constant 0 : index
    %19 = vector.load %arg1[%c3, %c0_13, %c0_14] : memref<10x32x128xf32, #tpu.memory_space<vmem>>, vector<1x32x128xf32>
    %20 = vector.shape_cast %19 : vector<1x32x128xf32> to vector<32x128xf32>
    %cst_15 = arith.constant dense<0.000000e+00> : vector<8x128xf32>
    %21 = tpu.matmul %18, %20, %cst_15 {dimension_numbers = #tpu.dot_dimension_numbers<[1], [0], [0], [1], [0, 0, 1, 1], [], []>} : vector<8x32xf32>, vector<32x128xf32>, vector<8x128xf32> -> vector<8x128xf32>
    %cst_16 = arith.constant 0.000000e+00 : f32
    %22 = vector.broadcast %cst_16 : f32 to vector<8x128xf32>
    %23 = arith.maximumf %21, %22 : vector<8x128xf32>
    %24 = vector.extract_strided_slice %23 {offsets = [0, 0], sizes = [8, 32], strides = [1, 1]} : vector<8x128xf32> to vector<8x32xf32>
    %c4 = arith.constant 4 : index
    %c0_17 = arith.constant 0 : index
    %c0_18 = arith.constant 0 : index
    %25 = vector.load %arg1[%c4, %c0_17, %c0_18] : memref<10x32x128xf32, #tpu.memory_space<vmem>>, vector<1x32x128xf32>
    %26 = vector.shape_cast %25 : vector<1x32x128xf32> to vector<32x128xf32>
    %cst_19 = arith.constant dense<0.000000e+00> : vector<8x128xf32>
    %27 = tpu.matmul %24, %26, %cst_19 {dimension_numbers = #tpu.dot_dimension_numbers<[1], [0], [0], [1], [0, 0, 1, 1], [], []>} : vector<8x32xf32>, vector<32x128xf32>, vector<8x128xf32> -> vector<8x128xf32>
    %cst_20 = arith.constant 0.000000e+00 : f32
    %28 = vector.broadcast %cst_20 : f32 to vector<8x128xf32>
    %29 = arith.maximumf %27, %28 : vector<8x128xf32>
    %30 = vector.extract_strided_slice %29 {offsets = [0, 0], sizes = [8, 32], strides = [1, 1]} : vector<8x128xf32> to vector<8x32xf32>
    %c5 = arith.constant 5 : index
    %c0_21 = arith.constant 0 : index
    %c0_22 = arith.constant 0 : index
    %31 = vector.load %arg1[%c5, %c0_21, %c0_22] : memref<10x32x128xf32, #tpu.memory_space<vmem>>, vector<1x32x128xf32>
    %32 = vector.shape_cast %31 : vector<1x32x128xf32> to vector<32x128xf32>
    %cst_23 = arith.constant dense<0.000000e+00> : vector<8x128xf32>
    %33 = tpu.matmul %30, %32, %cst_23 {dimension_numbers = #tpu.dot_dimension_numbers<[1], [0], [0], [1], [0, 0, 1, 1], [], []>} : vector<8x32xf32>, vector<32x128xf32>, vector<8x128xf32> -> vector<8x128xf32>
    %cst_24 = arith.constant 0.000000e+00 : f32
    %34 = vector.broadcast %cst_24 : f32 to vector<8x128xf32>
    %35 = arith.maximumf %33, %34 : vector<8x128xf32>
    %36 = vector.extract_strided_slice %35 {offsets = [0, 0], sizes = [8, 32], strides = [1, 1]} : vector<8x128xf32> to vector<8x32xf32>
    %c6 = arith.constant 6 : index
    %c0_25 = arith.constant 0 : index
    %c0_26 = arith.constant 0 : index
    %37 = vector.load %arg1[%c6, %c0_25, %c0_26] : memref<10x32x128xf32, #tpu.memory_space<vmem>>, vector<1x32x128xf32>
    %38 = vector.shape_cast %37 : vector<1x32x128xf32> to vector<32x128xf32>
    %cst_27 = arith.constant dense<0.000000e+00> : vector<8x128xf32>
    %39 = tpu.matmul %36, %38, %cst_27 {dimension_numbers = #tpu.dot_dimension_numbers<[1], [0], [0], [1], [0, 0, 1, 1], [], []>} : vector<8x32xf32>, vector<32x128xf32>, vector<8x128xf32> -> vector<8x128xf32>
    %cst_28 = arith.constant 0.000000e+00 : f32
    %40 = vector.broadcast %cst_28 : f32 to vector<8x128xf32>
    %41 = arith.maximumf %39, %40 : vector<8x128xf32>
    %42 = vector.extract_strided_slice %41 {offsets = [0, 0], sizes = [8, 32], strides = [1, 1]} : vector<8x128xf32> to vector<8x32xf32>
    %c7 = arith.constant 7 : index
    %c0_29 = arith.constant 0 : index
    %c0_30 = arith.constant 0 : index
    %43 = vector.load %arg1[%c7, %c0_29, %c0_30] : memref<10x32x128xf32, #tpu.memory_space<vmem>>, vector<1x32x128xf32>
    %44 = vector.shape_cast %43 : vector<1x32x128xf32> to vector<32x128xf32>
    %cst_31 = arith.constant dense<0.000000e+00> : vector<8x128xf32>
    %45 = tpu.matmul %42, %44, %cst_31 {dimension_numbers = #tpu.dot_dimension_numbers<[1], [0], [0], [1], [0, 0, 1, 1], [], []>} : vector<8x32xf32>, vector<32x128xf32>, vector<8x128xf32> -> vector<8x128xf32>
    %cst_32 = arith.constant 0.000000e+00 : f32
    %46 = vector.broadcast %cst_32 : f32 to vector<8x128xf32>
    %47 = arith.maximumf %45, %46 : vector<8x128xf32>
    %48 = vector.extract_strided_slice %47 {offsets = [0, 0], sizes = [8, 32], strides = [1, 1]} : vector<8x128xf32> to vector<8x32xf32>
    %c8 = arith.constant 8 : index
    %c0_33 = arith.constant 0 : index
    %c0_34 = arith.constant 0 : index
    %49 = vector.load %arg1[%c8, %c0_33, %c0_34] : memref<10x32x128xf32, #tpu.memory_space<vmem>>, vector<1x32x128xf32>
    %50 = vector.shape_cast %49 : vector<1x32x128xf32> to vector<32x128xf32>
    %cst_35 = arith.constant dense<0.000000e+00> : vector<8x128xf32>
    %51 = tpu.matmul %48, %50, %cst_35 {dimension_numbers = #tpu.dot_dimension_numbers<[1], [0], [0], [1], [0, 0, 1, 1], [], []>} : vector<8x32xf32>, vector<32x128xf32>, vector<8x128xf32> -> vector<8x128xf32>
    %cst_36 = arith.constant 0.000000e+00 : f32
    %52 = vector.broadcast %cst_36 : f32 to vector<8x128xf32>
    %53 = arith.maximumf %51, %52 : vector<8x128xf32>
    %54 = vector.extract_strided_slice %53 {offsets = [0, 0], sizes = [8, 32], strides = [1, 1]} : vector<8x128xf32> to vector<8x32xf32>
    %c9 = arith.constant 9 : index
    %c0_37 = arith.constant 0 : index
    %c0_38 = arith.constant 0 : index
    %55 = vector.load %arg1[%c9, %c0_37, %c0_38] : memref<10x32x128xf32, #tpu.memory_space<vmem>>, vector<1x32x128xf32>
    %56 = vector.shape_cast %55 : vector<1x32x128xf32> to vector<32x128xf32>
    %cst_39 = arith.constant dense<0.000000e+00> : vector<8x128xf32>
    %57 = tpu.matmul %54, %56, %cst_39 {dimension_numbers = #tpu.dot_dimension_numbers<[1], [0], [0], [1], [0, 0, 1, 1], [], []>} : vector<8x32xf32>, vector<32x128xf32>, vector<8x128xf32> -> vector<8x128xf32>
    %c0_40 = arith.constant 0 : index
    %c0_41 = arith.constant 0 : index
    %58 = vector.load %arg2[%c0_40, %c0_41] : memref<8x128xf32, #tpu.memory_space<vmem>>, vector<8x128xf32>
    tpu.vector_store %arg2[%c0_40, %c0_41], %57 {strides = array<i32>} : memref<8x128xf32, #tpu.memory_space<vmem>>, vector<8x128xf32>,
    return
  }
}

</mosaic_0001>

<bundles_post_ra>
// kernel: simplenet_forward.1
= control target key start
LH: loop header
LB: loop body
LE: loop exit
PB: predicated region body
PF: predicated region fallthrough
CT: control target
= control target key end

     0   :  { %7 = vsyncpa [#allocation3], 0  ;;  %s1018_s9 = smov [#allocation2]   ;;  %s1117_s0 = inlined_call_operand.vmem [shape: f32[8,32], index: 0, kind: input, shape index: {}]   ;;  %s1118_s1 = inlined_call_operand.hbm [shape: f32[10,32,128], index: 1, kind: input, shape index: {}]   ;;  %s1119_s2 = inlined_call_operand.vmem [shape: f32[8,128], index: 2, kind: output, shape index: {}]  }
   0x1   :  { %s15_s10 = sshll.u32 %s1018_s9, 4  ;;  %s16_s10 = int_to_ptr.vmem [resolvable:$true] %s15_s10 }
   0x2   :  { %s1004_s11 = scalar_lea.vmem %s16_s10, 5120  ;;  %p1009_p1 = scmp.lt.s32.totalorder %s16_s10, %s16_s10 }
   0x3   :  { %p1005_p0 = scmp.ne.s32.totalorder %s16_s10, %s1004_s11  ;;  %p1010_p2 = scmp.lt.s32.totalorder %s1004_s11, %s1004_s11 }
   0x5   :  { %p1011_p3 = por %p1010_p2, %p1009_p1 }
   0x7   :  { %p1012_p4 = pnand %p1011_p3, %p1005_p0 }
   0x9   :  { %1015 = shalt.err (!%p1012_p4)
}
   0xa   :  { %s1019_s12 = smov 128   ;;  %s1020_s13 = smov 8  }
   0xb   :  { %21 = dma.hbm_to_vmem [thread:$0]  %s1118_s1, 5120, %s16_s10, [#allocation3], %s1019_s12, %s1019_s12, %s1020_s13  }
   0xc   :  { %1016 = dma.done.wait [#allocation3], 5120  }
   0xd   :  { %1017 = vsyncadd [#allocation3], 4294962176  ;;  %v1021_v0 = vmov 0.0   ;;  %vm1022_vm0 = vmmov 0   ;;  %v29_v1 = vld [vmem:[#allocation2 + $0x18] sm:$0xff]  ;;  %v28_v2 = vld [vmem:[#allocation2 + $0x10] sm:$0xff] }
   0xe   :  { %881 = vmatprep.subr.mxu0 %v1021_v0  ;;  %889 = vmatprep.mubr.msk.f32.mxu0 %vm1022_vm0, %v1021_v0  ;;  %v109_v3 = vld [vmem:[#allocation2 + $0x38] sm:$0xff]  ;;  %v27_v4 = vld [vmem:[#allocation2 + $0x8] sm:$0xff]  ;;  %v108_v5 = vld [vmem:[#allocation2 + $0x30] sm:$0xff]  ;;  %vm30_vm1 = vcmask 261120  }
   0xf   :  { %892 = vmatprep.subr.mxu1 %v1021_v0  ;;  %900 = vmatprep.mubr.msk.f32.mxu1 %vm1022_vm0, %v1021_v0  ;;  %v26_v6 = vld [vmem:[#allocation2] sm:$0xff]  ;;  %v107_v8 = vld [vmem:[#allocation2 + $0x28] sm:$0xff]  ;;  %v188_v10 = vld [vmem:[#allocation2 + $0x58] sm:$0xff] }
  0x10   :  { %882 = vmatpush3.msra.mxu0 %v29_v1  ;;  %893 = vmatpush3.msra.mxu1 %v109_v3  ;;  %v25_v7 = vld [vmem:[%s1117_s0] sm:$0xff]  ;;  %v187_v11 = vld [vmem:[#allocation2 + $0x50] sm:$0xff]  ;;  %v186_v15 = vld [vmem:[#allocation2 + $0x48] sm:$0xff] }
  0x11   :  { %883 = vmatprep.subr.mxu0 %v1021_v0  ;;  %894 = vmatprep.subr.mxu1 %v1021_v0  ;;  %v106_v9 = vld [vmem:[#allocation2 + $0x20] sm:$0xff]  ;;  %v267_v17 = vld [vmem:[#allocation2 + $0x78] sm:$0xff]  ;;  %v266_v18 = vld [vmem:[#allocation2 + $0x70] sm:$0xff] }
  0x12   :  { %884 = vmatpush3.msra.mxu0 %v28_v2  ;;  %895 = vmatpush3.msra.mxu1 %v108_v5  ;;  %v185_v16 = vld [vmem:[#allocation2 + $0x40] sm:$0xff]  ;;  %v265_v22 = vld [vmem:[#allocation2 + $0x68] sm:$0xff]  ;;  %v346_v24 = vld [vmem:[#allocation2 + $0x98] sm:$0xff] }
  0x13   :  { %885 = vmatprep.subr.mxu0 %v1021_v0  ;;  %896 = vmatprep.subr.mxu1 %v1021_v0  ;;  %v264_v23 = vld [vmem:[#allocation2 + $0x60] sm:$0xff]  ;;  %v345_v25 = vld [vmem:[#allocation2 + $0x90] sm:$0xff]  ;;  %v344_v29 = vld [vmem:[#allocation2 + $0x88] sm:$0xff] }
  0x14   :  { %886 = vmatpush3.msra.mxu0 %v27_v4  ;;  %897 = vmatpush3.msra.mxu1 %v107_v8  ;;  %v343_v30 = vld [vmem:[#allocation2 + $0x80] sm:$0xff]  ;;  %v425_v31 = vld [vmem:[#allocation2 + $0xb8] sm:$0xff]  ;;  %v424_v32 = vld [vmem:[#allocation2 + $0xb0] sm:$0xff] }
  0x15   :  { %887 = vmatprep.subr.mxu0 %v1021_v0  ;;  %898 = vmatprep.subr.mxu1 %v1021_v0  ;;  %v423_v36 = vld [vmem:[#allocation2 + $0xa8] sm:$0xff]  ;;  %v422_v37 = vld [vmem:[#allocation2 + $0xa0] sm:$0xff]  ;;  %v504_v38 = vld [vmem:[#allocation2 + $0xd8] sm:$0xff] }
  0x16   :  { %888 = vmatpush3.msra.mxu0 %v26_v6  ;;  %899 = vmatpush3.msra.mxu1 %v106_v9  ;;  %v503_v39 = vld [vmem:[#allocation2 + $0xd0] sm:$0xff]  ;;  %v502_v43 = vld [vmem:[#allocation2 + $0xc8] sm:$0xff]  ;;  %v501_v44 = vld [vmem:[#allocation2 + $0xc0] sm:$0xff] }
  0x17   :  { %890 = vmatmul.mubr.msk.f32.vlgmr.msra.gmra.mxu0 %vm30_vm1, %v25_v7  ;;  %903 = vmatprep.subr.mxu0 %v1021_v0  ;;  %v583_v45 = vld [vmem:[#allocation2 + $0xf8] sm:$0xff]  ;;  %v582_v46 = vld [vmem:[#allocation2 + $0xf0] sm:$0xff]  ;;  %v581_v50 = vld [vmem:[#allocation2 + $0xe8] sm:$0xff] }
  0x18   :  { %911 = vmatprep.mubr.msk.f32.mxu0 %vm1022_vm0, %v1021_v0  ;;  %914 = vmatprep.subr.mxu1 %v1021_v0  ;;  %v580_v51 = vld [vmem:[#allocation2 + $0xe0] sm:$0xff]  ;;  %v662_v52 = vld [vmem:[#allocation2 + $0x118] sm:$0xff]  ;;  %v661_v53 = vld [vmem:[#allocation2 + $0x110] sm:$0xff] }
  0x19   :  { %904 = vmatpush3.msra.mxu0 %v188_v10  ;;  %v660_v57 = vld [vmem:[#allocation2 + $0x108] sm:$0xff]  ;;  %v659_v58 = vld [vmem:[#allocation2 + $0x100] sm:$0xff]  ;;  %v741_v59 = vld [vmem:[#allocation2 + $0x138] sm:$0xff] }
  0x1a   :  { %905 = vmatprep.subr.mxu0 %v1021_v0  ;;  %v740_v60 = vld [vmem:[#allocation2 + $0x130] sm:$0xff]  ;;  %v739_v1 = vld [vmem:[#allocation2 + $0x128] sm:$0xff]  ;;  %v738_v2 = vld [vmem:[#allocation2 + $0x120] sm:$0xff] }
  0x1b   :  { %906 = vmatpush3.msra.mxu0 %v187_v11 }
  0x1c   :  { %907 = vmatprep.subr.mxu0 %v1021_v0 }
  0x1d   :  { %908 = vmatpush3.msra.mxu0 %v186_v15 }
  0x1e   :  { %909 = vmatprep.subr.mxu0 %v1021_v0 }
  0x1f   :  { %910 = vmatpush3.msra.mxu0 %v185_v16 }
  0x20   :  { %925 = vmatprep.subr.mxu0 %v1021_v0 }
  0xd7   :  { %v100_v12 = vpop.f32.mrf.mxu0 }
  0xd8   :  { %v104_v13 = vmax.f32 %v100_v12, 0.0 }
  0xd9   :  { %v891_v14 = vpop.f32.mrf.mxu0 }
  0xda   :  { %901 = vmatmul.mubr.msk.f32.vlgmr.msra.gmra.mxu1 %vm30_vm1, %v104_v13 }
  0xdb   :  { %922 = vmatprep.mubr.msk.f32.mxu1 %vm1022_vm0, %v1021_v0  ;;  %915 = vmatpush3.msra.mxu1 %v267_v17 }
  0xdc   :  { %916 = vmatprep.subr.mxu1 %v1021_v0 }
  0xdd   :  { %917 = vmatpush3.msra.mxu1 %v266_v18 }
  0xde   :  { %918 = vmatprep.subr.mxu1 %v1021_v0 }
  0xdf   :  { %919 = vmatpush3.msra.mxu1 %v265_v22 }
  0xe0   :  { %920 = vmatprep.subr.mxu1 %v1021_v0 }
  0xe1   :  { %921 = vmatpush3.msra.mxu1 %v264_v23 }
  0xe2   :  { %936 = vmatprep.subr.mxu1 %v1021_v0 }
 0x19a   :  { %v179_v19 = vpop.f32.mrf.mxu1 }
 0x19b   :  { %v183_v20 = vmax.f32 %v179_v19, 0.0 }
 0x19c   :  { %v902_v21 = vpop.f32.mrf.mxu1 }
 0x19d   :  { %912 = vmatmul.mubr.msk.f32.vlgmr.msra.gmra.mxu0 %vm30_vm1, %v183_v20 }
 0x19e   :  { %933 = vmatprep.mubr.msk.f32.mxu0 %vm1022_vm0, %v1021_v0  ;;  %926 = vmatpush3.msra.mxu0 %v346_v24 }
 0x19f   :  { %927 = vmatprep.subr.mxu0 %v1021_v0 }
 0x1a0   :  { %928 = vmatpush3.msra.mxu0 %v345_v25 }
 0x1a1   :  { %929 = vmatprep.subr.mxu0 %v1021_v0 }
 0x1a2   :  { %930 = vmatpush3.msra.mxu0 %v344_v29 }
 0x1a3   :  { %931 = vmatprep.subr.mxu0 %v1021_v0 }
 0x1a4   :  { %932 = vmatpush3.msra.mxu0 %v343_v30 }
 0x1a5   :  { %947 = vmatprep.subr.mxu0 %v1021_v0 }
 0x25d   :  { %v258_v26 = vpop.f32.mrf.mxu0 }
 0x25e   :  { %v262_v27 = vmax.f32 %v258_v26, 0.0 }
 0x25f   :  { %v913_v28 = vpop.f32.mrf.mxu0 }
 0x260   :  { %923 = vmatmul.mubr.msk.f32.vlgmr.msra.gmra.mxu1 %vm30_vm1, %v262_v27 }
 0x261   :  { %944 = vmatprep.mubr.msk.f32.mxu1 %vm1022_vm0, %v1021_v0  ;;  %937 = vmatpush3.msra.mxu1 %v425_v31 }
 0x262   :  { %938 = vmatprep.subr.mxu1 %v1021_v0 }
 0x263   :  { %939 = vmatpush3.msra.mxu1 %v424_v32 }
 0x264   :  { %940 = vmatprep.subr.mxu1 %v1021_v0 }
 0x265   :  { %941 = vmatpush3.msra.mxu1 %v423_v36 }
 0x266   :  { %942 = vmatprep.subr.mxu1 %v1021_v0 }
 0x267   :  { %943 = vmatpush3.msra.mxu1 %v422_v37 }
 0x268   :  { %958 = vmatprep.subr.mxu1 %v1021_v0 }
 0x320   :  { %v337_v33 = vpop.f32.mrf.mxu1 }
 0x321   :  { %v341_v34 = vmax.f32 %v337_v33, 0.0 }
 0x322   :  { %v924_v35 = vpop.f32.mrf.mxu1 }
 0x323   :  { %934 = vmatmul.mubr.msk.f32.vlgmr.msra.gmra.mxu0 %vm30_vm1, %v341_v34 }
 0x324   :  { %955 = vmatprep.mubr.msk.f32.mxu0 %vm1022_vm0, %v1021_v0  ;;  %948 = vmatpush3.msra.mxu0 %v504_v38 }
 0x325   :  { %949 = vmatprep.subr.mxu0 %v1021_v0 }
 0x326   :  { %950 = vmatpush3.msra.mxu0 %v503_v39 }
 0x327   :  { %951 = vmatprep.subr.mxu0 %v1021_v0 }
 0x328   :  { %952 = vmatpush3.msra.mxu0 %v502_v43 }
 0x329   :  { %953 = vmatprep.subr.mxu0 %v1021_v0 }
 0x32a   :  { %954 = vmatpush3.msra.mxu0 %v501_v44 }
 0x32b   :  { %969 = vmatprep.subr.mxu0 %v1021_v0 }
 0x3e3   :  { %v416_v40 = vpop.f32.mrf.mxu0 }
 0x3e4   :  { %v420_v41 = vmax.f32 %v416_v40, 0.0 }
 0x3e5   :  { %v935_v42 = vpop.f32.mrf.mxu0 }
 0x3e6   :  { %945 = vmatmul.mubr.msk.f32.vlgmr.msra.gmra.mxu1 %vm30_vm1, %v420_v41 }
 0x3e7   :  { %966 = vmatprep.mubr.msk.f32.mxu1 %vm1022_vm0, %v1021_v0  ;;  %959 = vmatpush3.msra.mxu1 %v583_v45 }
 0x3e8   :  { %960 = vmatprep.subr.mxu1 %v1021_v0 }
 0x3e9   :  { %961 = vmatpush3.msra.mxu1 %v582_v46 }
 0x3ea   :  { %962 = vmatprep.subr.mxu1 %v1021_v0 }
 0x3eb   :  { %963 = vmatpush3.msra.mxu1 %v581_v50 }
 0x3ec   :  { %964 = vmatprep.subr.mxu1 %v1021_v0 }
 0x3ed   :  { %965 = vmatpush3.msra.mxu1 %v580_v51 }
 0x3ee   :  { %980 = vmatprep.subr.mxu1 %v1021_v0 }
 0x4a6   :  { %v495_v47 = vpop.f32.mrf.mxu1 }
 0x4a7   :  { %v499_v48 = vmax.f32 %v495_v47, 0.0 }
 0x4a8   :  { %v946_v49 = vpop.f32.mrf.mxu1 }
 0x4a9   :  { %956 = vmatmul.mubr.msk.f32.vlgmr.msra.gmra.mxu0 %vm30_vm1, %v499_v48 }
 0x4aa   :  { %977 = vmatprep.mubr.msk.f32.mxu0 %vm1022_vm0, %v1021_v0  ;;  %970 = vmatpush3.msra.mxu0 %v662_v52 }
 0x4ab   :  { %971 = vmatprep.subr.mxu0 %v1021_v0 }
 0x4ac   :  { %972 = vmatpush3.msra.mxu0 %v661_v53 }
 0x4ad   :  { %973 = vmatprep.subr.mxu0 %v1021_v0 }
 0x4ae   :  { %974 = vmatpush3.msra.mxu0 %v660_v57 }
 0x4af   :  { %975 = vmatprep.subr.mxu0 %v1021_v0 }
 0x4b0   :  { %976 = vmatpush3.msra.mxu0 %v659_v58 }
 0x569   :  { %v574_v54 = vpop.f32.mrf.mxu0 }
 0x56a   :  { %v578_v55 = vmax.f32 %v574_v54, 0.0 }
 0x56b   :  { %v957_v56 = vpop.f32.mrf.mxu0 }
 0x56c   :  { %967 = vmatmul.mubr.msk.f32.vlgmr.msra.gmra.mxu1 %vm30_vm1, %v578_v55 }
 0x56d   :  { %988 = vmatprep.mubr.msk.f32.mxu1 %vm1022_vm0, %v1021_v0  ;;  %981 = vmatpush3.msra.mxu1 %v741_v59 }
 0x56e   :  { %982 = vmatprep.subr.mxu1 %v1021_v0 }
 0x56f   :  { %983 = vmatpush3.msra.mxu1 %v740_v60 }
 0x570   :  { %984 = vmatprep.subr.mxu1 %v1021_v0 }
 0x571   :  { %985 = vmatpush3.msra.mxu1 %v739_v1 }
 0x572   :  { %986 = vmatprep.subr.mxu1 %v1021_v0 }
 0x573   :  { %987 = vmatpush3.msra.mxu1 %v738_v2 }
 0x62c   :  { %v653_v61 = vpop.f32.mrf.mxu1 }
 0x62d   :  { %v657_v62 = vmax.f32 %v653_v61, 0.0 }
 0x62e   :  { %v968_v63 = vpop.f32.mrf.mxu1 }
 0x62f   :  { %978 = vmatmul.mubr.msk.f32.vlgmr.msra.gmra.mxu0 %vm30_vm1, %v657_v62 }
 0x6ef   :  { %v732_v3 = vpop.f32.mrf.mxu0 }
 0x6f0   :  { %v736_v4 = vmax.f32 %v732_v3, 0.0 }
 0x6f1   :  { %v979_v5 = vpop.f32.mrf.mxu0 }
 0x6f2   :  { %989 = vmatmul.mubr.msk.f32.vlgmr.msra.gmra.mxu1 %vm30_vm1, %v736_v4 }
 0x7b2   :  { %v811_v6 = vpop.f32.mrf.mxu1 }
 0x7b3   :  { %815 = vst [vmem:[%s1119_s2] sm:$0xff] %v811_v6 }
 0x7b4   :  { %v990_v7 = vpop.f32.mrf.mxu1 }
 0x7b5   :  { %820 = vsyncpa [#allocation3], 1 }

</bundles_post_ra>
